<compile_context>
chip_gen: v7x
topology: tpu7x:2x2x1
jax: 0.10.0
libtpu: 0.0.40
codegen_flags: <defaults>
</compile_context>

<pallas_src>
import numpy as np

import jax
import jax.numpy as jnp
from jax.experimental import pallas as pl
from jax.experimental.pallas import tpu as pltpu

_OUT_W = 8  # narrow lane-padded output width; only columns 0..2 are meaningful


# --------------------------------------------------------------------------
# Kernel: per-(batch, spatial-tile) weighted spatial reduction (VPU + XLU).
# --------------------------------------------------------------------------

def _make_com_kernel(n_w):
    def kernel(w_ref, heat_ref, out_ref):
        # w_ref   : (1, n_w, tk)   f32 precomputed weight rows
        # heat_ref: (1, C, tk)     heatmaps in their native dtype
        # out_ref : (1, C, _OUT_W) f32, resident across the k axis (accumulator)
        k = pl.program_id(1)

        @pl.when(k == 0)
        def _():
            out_ref[...] = jnp.zeros_like(out_ref)

        hm = heat_ref[0]                                    # (C, tk)
        c = hm.shape[0]
        col = jax.lax.broadcasted_iota(jnp.int32, (c, _OUT_W), 1)
        partial = jnp.zeros((c, _OUT_W), jnp.float32)
        for j in range(n_w):                                # static unroll (2 or 3)
            wj = w_ref[0, j:j + 1, :]                       # (1, tk) f32
            # bf16 heat promotes to f32 in the multiply; sum accumulates in f32.
            sj = jnp.sum(hm * wj, axis=-1, keepdims=True)   # (C, 1) f32
            partial = partial + jnp.where(col == j, sj, 0.0)
        out_ref[0] += partial

    return kernel


# --------------------------------------------------------------------------
# Chip-aware tiling.
# --------------------------------------------------------------------------

def _vmem_limit_bytes():
    """~3/4 of physical VMEM (<=96 MiB); conservative 48 MiB fallback."""
    phys = 64 * 1024 * 1024
    try:
        phys = int(pltpu.get_tpu_info().vmem_capacity_bytes)
    except Exception:
        pass
    return int(min((phys * 3) // 4, 96 * 1024 * 1024))


def _max_tk(C, itemsize, vmem_limit):
    """Largest spatial tile (multiple of 128) whose resident footprint fits."""
    c_sub = max(8, ((C + 7) // 8) * 8)  # sublane-padded rows resident in VMEM
    # Per tk-column resident bytes:
    #   double-buffered heat block        : 2 * c_sub * itemsize
    #   double-buffered weight block      : 2 * 8 * 4   (n_w rows pad to 8, f32)
    #   f32 elementwise intermediates     : 2 * c_sub * 4 (conservative)
    per_col = 2 * c_sub * itemsize + 2 * 8 * 4 + 2 * c_sub * 4
    budget = max(1 << 20, vmem_limit - (2 << 20))           # reserve for out/misc
    fit_tk = budget // per_col
    # Cap the f32 working copy of one heat block at ~8 MiB: already on the HBM
    # roofline plateau; bigger only bloats compile-time vreg unrolling.
    cap_tk = (8 << 20) // (c_sub * 4)
    return int(max(128, (min(fit_tk, cap_tk) // 128) * 128))


def _weighted_sums(weights, heat_flat, n_w, tk_override=None):
    """weights: (B, n_w, HW) f32, heat_flat: (B, C, HW) -> (B, C, 3) f32 sums."""
    B, C, HW = heat_flat.shape
    itemsize = jnp.dtype(heat_flat.dtype).itemsize
    vmem_limit = _vmem_limit_bytes()
    max_tk = _max_tk(C, itemsize, vmem_limit)

    if tk_override is not None:
        tk = int(tk_override)
        assert tk % 128 == 0
    elif HW <= max_tk:
        tk = HW                      # single full-dim block: no HBM padding copy
    else:
        tk = max_tk
        for cand in range(max_tk, 127, -128):   # prefer a divisor: no padding
            if HW % cand == 0:
                tk = cand
                break

    n_k = int(pl.cdiv(HW, tk))
    HW_pad = n_k * tk
    if HW_pad != HW:
        # Zero padding: padded spatial columns have zero heat AND zero weight,
        # so they contribute exactly 0 to every sum.
        heat_flat = jnp.pad(heat_flat, ((0, 0), (0, 0), (0, HW_pad - HW)))
        weights = jnp.pad(weights, ((0, 0), (0, 0), (0, HW_pad - HW)))

    out = pl.pallas_call(
        _make_com_kernel(n_w),
        out_shape=jax.ShapeDtypeStruct((B, C, _OUT_W), jnp.float32),
        grid_spec=pltpu.PrefetchScalarGridSpec(
            num_scalar_prefetch=0,
            grid=(B, n_k),
            in_specs=[
                pl.BlockSpec((1, n_w, tk), lambda b, k: (b, 0, k)),
                pl.BlockSpec((1, C, tk), lambda b, k: (b, 0, k)),
            ],
            out_specs=pl.BlockSpec((1, C, _OUT_W), lambda b, k: (b, 0, 0)),
        ),
        compiler_params=pltpu.CompilerParams(
            dimension_semantics=("parallel", "arbitrary"),
            vmem_limit_bytes=min(vmem_limit, 64 * 1024 * 1024),
        ),
    )(weights, heat_flat)
    return out[..., :3]


# --------------------------------------------------------------------------
# Forward pass (matches the PyTorch module semantics).
# --------------------------------------------------------------------------

def quasi_manhattan_center_of_mass(grid, heatmaps, mode="periodic",
                                   epsilon=1e-12, _tk_override=None):
    """grid: (B, 2, H, W), heatmaps: (B, C, H, W) -> (B, 2*(C//2), 2) float32."""
    B, C, H, W = heatmaps.shape
    half = C // 2
    HW = H * W

    # Precompute lane-dense weight rows in f32 (keeps trig precision even for
    # bf16 inputs); heatmaps keep their native dtype for the kernel DMA.
    gx = grid[:, 0].reshape(B, HW).astype(jnp.float32)
    gy = grid[:, 1].reshape(B, HW).astype(jnp.float32)
    if mode == "periodic":
        phi_i = gx * np.pi + np.pi
        weights = jnp.stack(
            [jnp.cos(phi_i), jnp.sin(phi_i), gy * (0.5 * np.pi)], axis=1)
        n_w = 3
    else:
        weights = jnp.stack([gx, gy], axis=1)
        n_w = 2

    heat_flat = heatmaps.reshape(B, C, HW)
    sums = _weighted_sums(weights, heat_flat, n_w, _tk_override)   # (B, C, 3)

    if mode == "periodic":
        s_chi, s_zeta, s_theta = sums[..., 0], sums[..., 1], sums[..., 2]
        chi = (s_chi[:, :half] + s_chi[:, half:2 * half]) * 0.5
        zeta = (s_zeta[:, :half] + s_zeta[:, half:2 * half]) * 0.5
        phi = jnp.arctan2(-zeta, -chi + epsilon)
        theta_t = s_theta[:, :half]
        theta_b = s_theta[:, half:2 * half]
        top = jnp.stack([phi / np.pi, theta_t / (np.pi * 0.5)], axis=-1)
        bottom = jnp.stack([phi / np.pi, theta_b / (np.pi * 0.5)], axis=-1)
        return jnp.concatenate([top, bottom], axis=1)
    else:
        s_x, s_y = sums[..., 0], sums[..., 1]
        x = (s_x[:, :half] + s_x[:, half:2 * half]) * 0.5
        top = jnp.stack([x, s_y[:, :half]], axis=-1)
        bottom = jnp.stack([x, s_y[:, half:2 * half]], axis=-1)
        return jnp.concatenate([top, bottom], axis=1)


# --------------------------------------------------------------------------
# Pure-JAX references (direct transcription of the torch code) for checking.
# --------------------------------------------------------------------------

def _reference_periodic(grid, heatmaps, epsilon=1e-12):
    b, c, h, w = heatmaps.shape
    theta_i = grid[:, 1][:, None] * (0.5 * np.pi)
    phi_i = grid[:, 0][:, None] * np.pi + np.pi
    chi_i = jnp.cos(phi_i)
    zeta_i = jnp.sin(phi_i)
    top_coords, bottom_coords = [], []
    for i in range(c // 2):
        top_hm = heatmaps[:, i][:, None]
        bot_hm = heatmaps[:, i + c // 2][:, None]
        chi = jnp.sum(top_hm * chi_i + bot_hm * chi_i, axis=(2, 3)) / 2.0
        zeta = jnp.sum(top_hm * zeta_i + bot_hm * zeta_i, axis=(2, 3)) / 2.0
        phi = jnp.arctan2(-zeta, -chi + epsilon)
        theta_t = jnp.sum(top_hm * theta_i, axis=(2, 3))
        theta_b = jnp.sum(bot_hm * theta_i, axis=(2, 3))
        top_coords.append(jnp.concatenate([phi / np.pi,
                                           theta_t / (np.pi * 0.5)], axis=1))
        bottom_coords.append(jnp.concatenate([phi / np.pi,
                                              theta_b / (np.pi * 0.5)], axis=1))
    return jnp.concatenate([jnp.stack(top_coords, 1),
                            jnp.stack(bottom_coords, 1)], axis=1)


def _reference_standard(grid, heatmaps):
    b, c, h, w = heatmaps.shape
    gx = grid[:, 0][:, None]
    gy = grid[:, 1][:, None]
    top_l, bot_l = [], []
    for i in range(c // 2):
        th = heatmaps[:, i][:, None]
        bh = heatmaps[:, i + c // 2][:, None]
        x = jnp.sum(th * gx + bh * gx, axis=(2, 3)) / 2.0
        yt = jnp.sum(th * gy, axis=(2, 3))
        yb = jnp.sum(bh * gy, axis=(2, 3))
        top_l.append(jnp.concatenate([x, yt], axis=1))
        bot_l.append(jnp.concatenate([x, yb], axis=1))
    return jnp.concatenate([jnp.stack(top_l, 1), jnp.stack(bot_l, 1)], axis=1)


def _make_inputs(key, B, C, H, W):
    k_grid, k_heat = jax.random.split(key)
    ys = jnp.linspace(-1.0, 1.0, H)
    xs = jnp.linspace(-1.0, 1.0, W)
    gy, gx = jnp.meshgrid(ys, xs, indexing="ij")
    base = jnp.stack([gx, gy], axis=0)                           # (2, H, W)
    grid = jnp.broadcast_to(base, (B, 2, H, W)).astype(jnp.float32)
    grid = grid + 0.01 * jax.random.normal(k_grid, (B, 2, H, W),
                                           dtype=jnp.float32)
    logits = jax.random.normal(k_heat, (B, C, H * W), dtype=jnp.float32)
    heat = jax.nn.softmax(logits, axis=-1).reshape(B, C, H, W)
    return grid, heat


if __name__ == "__main__":
    key = jax.random.PRNGKey(0)
    k0, k1, k2 = jax.random.split(key, 3)

    # -- periodic / standard modes vs f32 reference --
    B, C, H, W = 2, 4, 16, 16
    grid, heatmaps = _make_inputs(k0, B, C, H, W)

    out = jax.block_until_ready(
        quasi_manhattan_center_of_mass(grid, heatmaps, mode="periodic"))
    ref = _reference_periodic(grid, heatmaps)
    assert out.shape == (B, C, 2), out.shape
    assert jnp.allclose(out, ref, atol=1e-5, rtol=1e-5), (
        f"periodic max abs err {jnp.max(jnp.abs(out - ref))}")

    out_std = jax.block_until_ready(
        quasi_manhattan_center_of_mass(grid, heatmaps, mode="standard"))
    ref_std = _reference_standard(grid, heatmaps)
    assert out_std.shape == (B, C, 2), out_std.shape
    assert jnp.allclose(out_std, ref_std, atol=1e-5, rtol=1e-5), (
        f"standard max abs err {jnp.max(jnp.abs(out_std - ref_std))}")

    # -- odd shapes: C not a multiple of 8, HW not a multiple of 128 (no pad) --
    B2, C2, H2, W2 = 1, 6, 17, 19
    grid2, heat2 = _make_inputs(k1, B2, C2, H2, W2)
    out2 = jax.block_until_ready(
        quasi_manhattan_center_of_mass(grid2, heat2, mode="periodic"))
    ref2 = _reference_periodic(grid2, heat2)
    assert out2.shape == (B2, C2, 2), out2.shape
    assert jnp.allclose(out2, ref2, atol=1e-5, rtol=1e-5), (
        f"odd-shape max abs err {jnp.max(jnp.abs(out2 - ref2))}")

    # -- multi-step spatial accumulation path (forced small tile) --
    B3, C3, H3, W3 = 2, 4, 16, 24       # HW = 384 -> 3 k-steps at tk = 128
    grid3, heat3 = _make_inputs(k2, B3, C3, H3, W3)
    out3 = jax.block_until_ready(
        quasi_manhattan_center_of_mass(grid3, heat3, mode="periodic",
                                       _tk_override=128))
    ref3 = _reference_periodic(grid3, heat3)
    assert out3.shape == (B3, C3, 2), out3.shape
    assert jnp.allclose(out3, ref3, atol=1e-5, rtol=1e-5), (
        f"multi-tile max abs err {jnp.max(jnp.abs(out3 - ref3))}")

    # -- native-bf16 heat path (weights stay f32 inside the kernel) --
    out_bf16 = jax.block_until_ready(
        quasi_manhattan_center_of_mass(grid.astype(jnp.bfloat16),
                                       heatmaps.astype(jnp.bfloat16),
                                       mode="periodic"))
    assert out_bf16.shape == (B, C, 2)
    assert bool(jnp.all(jnp.isfinite(out_bf16)))

    print("KERNEL_OK")
</pallas_src>

<mosaic_0001>
module attributes {stable_mosaic.version = 11 : i64} {
  func.func @kernel(%arg0: i32, %arg1: i32, %arg2: memref<1x3x256xf32, #tpu.memory_space<vmem>>, %arg3: memref<1x4x256xf32, #tpu.memory_space<vmem>>, %arg4: memref<1x4x8xf32, #tpu.memory_space<vmem>>) attributes {dimension_semantics = [#tpu.dimension_semantics<parallel>, #tpu.dimension_semantics<arbitrary>], iteration_bounds = array<i64: 2, 1>, scalar_prefetch = 0 : i64, scratch_operands = 0 : i64, tpu.core_type = #tpu.core_type<tc>, window_params = [{transform_indices = @transform_0, window_bounds = array<i64: 1, 3, 256>}, {transform_indices = @transform_1, window_bounds = array<i64: 1, 4, 256>}, {transform_indices = @transform_2, window_bounds = array<i64: 1, 4, 8>}]} {
    %c0_i32 = arith.constant 0 : i32
    %0 = arith.cmpi eq, %arg1, %c0_i32 : i32
    %1 = arith.extui %0 : i1 to i32
    %c0_i32_0 = arith.constant 0 : i32
    %2 = arith.cmpi ne, %1, %c0_i32_0 : i32
    scf.if %2 {
      %cst_23 = arith.constant 0.000000e+00 : f32
      %52 = vector.broadcast %cst_23 : f32 to vector<1x4x8xf32>
      %c0_24 = arith.constant 0 : index
      %c0_25 = arith.constant 0 : index
      %c0_26 = arith.constant 0 : index
      %53 = vector.load %arg4[%c0_24, %c0_25, %c0_26] : memref<1x4x8xf32, #tpu.memory_space<vmem>>, vector<1x4x8xf32>
      tpu.vector_store %arg4[%c0_24, %c0_25, %c0_26], %52 {strides = array<i32>} : memref<1x4x8xf32, #tpu.memory_space<vmem>>, vector<1x4x8xf32>,
    } else {
    }
    %c0 = arith.constant 0 : index
    %c0_1 = arith.constant 0 : index
    %c0_2 = arith.constant 0 : index
    %3 = vector.load %arg3[%c0, %c0_1, %c0_2] : memref<1x4x256xf32, #tpu.memory_space<vmem>>, vector<1x4x256xf32>
    %4 = vector.shape_cast %3 : vector<1x4x256xf32> to vector<4x256xf32>
    %5 = tpu.iota {dimensions = array<i32: 1>} : vector<4x8xi32>
    %cst = arith.constant 0.000000e+00 : f32
    %6 = vector.broadcast %cst : f32 to vector<4x8xf32>
    %c0_3 = arith.constant 0 : index
    %c0_4 = arith.constant 0 : index
    %c0_5 = arith.constant 0 : index
    %7 = vector.load %arg2[%c0_3, %c0_4, %c0_5] : memref<1x3x256xf32, #tpu.memory_space<vmem>>, vector<1x1x256xf32>
    %8 = vector.shape_cast %7 : vector<1x1x256xf32> to vector<1x256xf32>
    %9 = vector.broadcast %8 : vector<1x256xf32> to vector<4x256xf32>
    %10 = arith.mulf %4, %9 : vector<4x256xf32>
    %cst_6 = arith.constant dense<0.000000e+00> : vector<4xf32>
    %11 = vector.multi_reduction <add>, %10, %cst_6 [1] : vector<4x256xf32> to vector<4xf32>
    %12 = vector.shape_cast %11 : vector<4xf32> to vector<4x1xf32>
    %c0_i32_7 = arith.constant 0 : i32
    %13 = vector.broadcast %c0_i32_7 : i32 to vector<4x8xi32>
    %14 = arith.cmpi eq, %5, %13 : vector<4x8xi32>
    %cst_8 = arith.constant 0.000000e+00 : f32
    %15 = vector.shape_cast %12 : vector<4x1xf32> to vector<4x1xf32>
    %16 = vector.broadcast %15 : vector<4x1xf32> to vector<4x8xf32>
    %17 = vector.broadcast %cst_8 : f32 to vector<4x8xf32>
    %18 = arith.select %14, %16, %17 : vector<4x8xi1>, vector<4x8xf32>
    %19 = arith.addf %6, %18 : vector<4x8xf32>
    %c0_9 = arith.constant 0 : index
    %c1 = arith.constant 1 : index
    %c0_10 = arith.constant 0 : index
    %20 = vector.load %arg2[%c0_9, %c1, %c0_10] : memref<1x3x256xf32, #tpu.memory_space<vmem>>, vector<1x1x256xf32>
    %21 = vector.shape_cast %20 : vector<1x1x256xf32> to vector<1x256xf32>
    %22 = vector.broadcast %21 : vector<1x256xf32> to vector<4x256xf32>
    %23 = arith.mulf %4, %22 : vector<4x256xf32>
    %cst_11 = arith.constant dense<0.000000e+00> : vector<4xf32>
    %24 = vector.multi_reduction <add>, %23, %cst_11 [1] : vector<4x256xf32> to vector<4xf32>
    %25 = vector.shape_cast %24 : vector<4xf32> to vector<4x1xf32>
    %c1_i32 = arith.constant 1 : i32
    %26 = vector.broadcast %c1_i32 : i32 to vector<4x8xi32>
    %27 = arith.cmpi eq, %5, %26 : vector<4x8xi32>
    %cst_12 = arith.constant 0.000000e+00 : f32
    %28 = vector.shape_cast %25 : vector<4x1xf32> to vector<4x1xf32>
    %29 = vector.broadcast %28 : vector<4x1xf32> to vector<4x8xf32>
    %30 = vector.broadcast %cst_12 : f32 to vector<4x8xf32>
    %31 = arith.select %27, %29, %30 : vector<4x8xi1>, vector<4x8xf32>
    %32 = arith.addf %19, %31 : vector<4x8xf32>
    %c0_13 = arith.constant 0 : index
    %c2 = arith.constant 2 : index
    %c0_14 = arith.constant 0 : index
    %33 = vector.load %arg2[%c0_13, %c2, %c0_14] : memref<1x3x256xf32, #tpu.memory_space<vmem>>, vector<1x1x256xf32>
    %34 = vector.shape_cast %33 : vector<1x1x256xf32> to vector<1x256xf32>
    %35 = vector.broadcast %34 : vector<1x256xf32> to vector<4x256xf32>
    %36 = arith.mulf %4, %35 : vector<4x256xf32>
    %cst_15 = arith.constant dense<0.000000e+00> : vector<4xf32>
    %37 = vector.multi_reduction <add>, %36, %cst_15 [1] : vector<4x256xf32> to vector<4xf32>
    %38 = vector.shape_cast %37 : vector<4xf32> to vector<4x1xf32>
    %c2_i32 = arith.constant 2 : i32
    %39 = vector.broadcast %c2_i32 : i32 to vector<4x8xi32>
    %40 = arith.cmpi eq, %5, %39 : vector<4x8xi32>
    %cst_16 = arith.constant 0.000000e+00 : f32
    %41 = vector.shape_cast %38 : vector<4x1xf32> to vector<4x1xf32>
    %42 = vector.broadcast %41 : vector<4x1xf32> to vector<4x8xf32>
    %43 = vector.broadcast %cst_16 : f32 to vector<4x8xf32>
    %44 = arith.select %40, %42, %43 : vector<4x8xi1>, vector<4x8xf32>
    %45 = arith.addf %32, %44 : vector<4x8xf32>
    %c0_17 = arith.constant 0 : index
    %c0_18 = arith.constant 0 : index
    %c0_19 = arith.constant 0 : index
    %46 = vector.load %arg4[%c0_17, %c0_18, %c0_19] : memref<1x4x8xf32, #tpu.memory_space<vmem>>, vector<1x4x8xf32>
    %47 = vector.shape_cast %46 : vector<1x4x8xf32> to vector<4x8xf32>
    %48 = arith.addf %47, %45 : vector<4x8xf32>
    %c0_20 = arith.constant 0 : index
    %c0_21 = arith.constant 0 : index
    %c0_22 = arith.constant 0 : index
    %49 = vector.load %arg4[%c0_20, %c0_21, %c0_22] : memref<1x4x8xf32, #tpu.memory_space<vmem>>, vector<1x4x8xf32>
    %50 = vector.shape_cast %49 : vector<1x4x8xf32> to vector<4x8xf32>
    %51 = vector.shape_cast %48 : vector<4x8xf32> to vector<1x4x8xf32>
    tpu.vector_store %arg4[%c0_20, %c0_21, %c0_22], %51 {strides = array<i32>} : memref<1x4x8xf32, #tpu.memory_space<vmem>>, vector<1x4x8xf32>,
    return
  }
  func.func @transform_0(%arg0: i32, %arg1: i32) -> (i32, i32, i32) {
    %c0_i32 = arith.constant 0 : i32
    %c0_i32_0 = arith.constant 0 : i32
    return %arg0, %c0_i32, %arg1 : i32, i32, i32
  }
  func.func @transform_1(%arg0: i32, %arg1: i32) -> (i32, i32, i32) {
    %c0_i32 = arith.constant 0 : i32
    %c0_i32_0 = arith.constant 0 : i32
    return %arg0, %c0_i32, %arg1 : i32, i32, i32
  }
  func.func @transform_2(%arg0: i32, %arg1: i32) -> (i32, i32, i32) {
    %c0_i32 = arith.constant 0 : i32
    %c0_i32_0 = arith.constant 0 : i32
    %c0_i32_1 = arith.constant 0 : i32
    return %arg0, %c0_i32, %c0_i32_0 : i32, i32, i32
  }
}

</mosaic_0001>

<bundles_post_ra>
// kernel: tpu_custom_call.1
= control target key start
LH: loop header
LB: loop body
LE: loop exit
PB: predicated region body
PF: predicated region fallthrough
CT: control target
= control target key end

     0   :  { %7 = vsyncpa [#allocation3], 0  ;;  %s687_s0 = inlined_call_operand.vmem [shape: f32[2,3,256], index: 0, kind: input, shape index: {}]   ;;  %s688_s1 = inlined_call_operand.vmem [shape: f32[2,4,256], index: 1, kind: input, shape index: {}]   ;;  %s689_s2 = inlined_call_operand.hbm [shape: f32[2,4,8], index: 2, kind: output, shape index: {}]  }
   0x1   :  { %9 = vsyncpa [#allocation3 + $0x1], 0  ;;  %s570_s9 = smov 0   ;;  %s572_s10 = smov 0  }
   0x2   :  { %s574_s11 = smov 0   ;;  %s576_s12 = smov 0  }
   0x3   :  { %s578_s13 = smov 0   ;;  %s580_s14 = smov 0  }
   0x4 LB: > { %s399_s15 = sadd.s32 4294967295, %s551_s14   ;;  %s400_s16 = sadd.s32 4294967294, %s551_s14   ;;  %s551_s14 = sphi %s580_s14, %s15_s14   ;;  %s547_s13 = sphi %s578_s13, %s696_s13   ;;  %s543_s12 = sphi %s576_s12, %s695_s12   ;;  %s539_s11 = sphi %s574_s11, %s694_s11   ;;  %s535_s10 = sphi %s572_s10, %s693_s10   ;;  %s531_s9 = sphi %s570_s9, %s692_s9  }
   0x5   : > { %s27_s17 = sadd.s32 1, %s547_s13  ;;  %s90_s18 = sadd.s32 1, %s539_s11 }
   0x6   : > { %p29_p0 = scmp.ge.s32.totalorder %s27_s17, 2  ;;  %p100_p1 = scmp.ne.s32.totalorder %s539_s11, %s535_s10 }
   0x7   : > { %p101_p2 = scmp.eq.s32.totalorder %s399_s15, 1  ;;  %p106_p3 = scmp.ne.s32.totalorder %s535_s10, %s531_s9 }
   0x8   : > { %s698_s17 = smov (%p29_p0, %s27_s17), 0  ;;  %p107_p5 = scmp.eq.s32.totalorder %s400_s16, 1 }
   0x9   : > { %p610_p4 = por %p101_p2, %p100_p1  ;;  %s87_s20 = ssub.s32 %s547_s13, %s698_s17 }
   0xa   : > { %p403_p6 = scmp.ge.s32.totalorder %s551_s14, 1  ;;  %p88_p7 = scmp.eq.s32.totalorder %s87_s20, 0 }
   0xb   : > { %p617_p8 = por %p107_p5, %p106_p3  ;;  %p151_p9 = scmp.lt.s32.totalorder %s551_s14, 3 }
   0xc   : > { %s623_s22 = scalar_select %p88_p7, %s539_s11, %s90_s18  }
   0xd   : > { %p152_p10 = pnand %p403_p6, %p151_p9 }
   0xe   : > { %p187_p11 = scmp.lt.s32.totalorder (!%p152_p10), %s543_s12, 1  ;;  %v213_v0 = vlaneseq (!%p152_p10)  ;;  %vm231_vm0 = vcmask (!%p152_p10), 1043456   ;;  %s183_s3 = sand.u32 (!%p152_p10), 1, %s535_s10   ;;  %vm210_vm1 = vcmask (!%p152_p10), 60416   ;;  %v553_v32 = vmov (!%p152_p10), 0.0  }
   0xf   : > { %155 = sbr.rel (%p152_p10) target bundleno = 205 (0xcd), region = 28  ;;  %s404_s4 = sshll.u32 (!%p152_p10), %s183_s3, 2 }
  0x10   : > { %v218_v1 = vshrl.u32 (!%p152_p10), %v213_v0, 7  ;;  %s185_s5 = scalar_lea.vmem (!%p152_p10), [#allocation2], %s404_s4  ;;  %v214_v33 = vand.u32 (!%p152_p10), 127, %v213_v0  ;;  %s412_s6 = sshll.u32 (!%p152_p10), %s543_s12, 6 }
  0x11   : > { %211 = vst.msk [vmem:[%s185_s5] sm:$0xf] (!%p152_p10), %vm210_vm1, %v553_v32  ;;  %s308_s7 = sshll.u32 (!%p152_p10), %s185_s5, 4  ;;  %s639_s16 = scalar_lea.hbm (!%p152_p10), %s689_s2, %s412_s6  ;;  %s641_s7 = int_to_ptr.vmem [resolvable:$true] %s308_s7 }
  0x12   : > { %v219_v2 = vsub.s32 (!%p152_p10), 0, %v218_v1  ;;  %v223_v3 = vsub.s32 (!%p152_p10), 1, %v218_v1  ;;  %vm237_vm2 = vcmp.eq.s32.totalorder (!%p152_p10), %v214_v33, 0  ;;  %vm262_vm3 = vcmp.eq.s32.totalorder (!%p152_p10), %v214_v33, 1  ;;  %s295_s18 = scalar_lea.sflag (!%p152_p10), [#allocation3], %s183_s3  ;;  %s473_s20 = scalar_lea.vmem (!%p152_p10), %s641_s7, 64 }
  0x13   : > { %vm287_vm4 = vcmp.eq.s32.totalorder (!%p152_p10), %v214_v33, 2  ;;  %p474_p12 = scmp.ne.s32.totalorder (!%p152_p10), %s641_s7, %s473_s20 }
  0x15   : > { %p475_p13 = pnand (!%p152_p10), %p474_p12, %p610_p4 }
  0x16   : > { %s188_s23 = scalar_select %p187_p11, %s543_s12, 1 }
  0x17   : > { %p476_p0 = pneg %p475_p13  ;;  %s554_s12 = smov [#allocation2]  }
  0x18   : > { %s415_s24 = sshll.u32 %s188_s23, 3  ;;  %v290_v41 = vld [vmem:[%s185_s5] sm:$0xf]  ;;  %s477_s23 = sshll.u32 %s554_s12, 4  ;;  %s478_s23 = int_to_ptr.vmem [resolvable:$false] %s477_s23 }
  0x19   : > { %s194_s27 = scalar_lea.vmem %s687_s0, %s415_s24  ;;  %s204_s30 = scalar_lea.vmem %s688_s1, %s415_s24 }
  0x1a   : > { %v215_v4 = vld [vmem:[%s194_s27] ss:$4 sm:$0x3]  ;;  %v409_v7 = vld [vmem:[%s194_s27 + $0x1] ss:$4 sm:$0x3]  ;;  %p480_p1 = scmp.lt.s32.totalorder %s641_s7, %s478_s23 }
  0x1b   : > { %v220_v5 = vrot.slane %v215_v4, %v219_v2  ;;  %v224_v6 = vrot.slane %v215_v4, %v223_v3  ;;  %v410_v8 = vld [vmem:[%s194_s27 + $0x2] ss:$4 sm:$0x3]  ;;  %v246_v10 = vrot.slane %v409_v7, %v219_v2  ;;  %v250_v11 = vrot.slane %v409_v7, %v223_v3  ;;  %s479_s24 = scalar_lea.vmem %s478_s23, 128 }
  0x1c   : > { %v212_v9 = vld [vmem:[%s204_s30] sm:$0xff]  ;;  %v271_v12 = vrot.slane %v410_v8, %v219_v2  ;;  %v275_v13 = vrot.slane %v410_v8, %v223_v3  ;;  %p481_p2 = scmp.lt.s32.totalorder %s479_s24, %s473_s20 }
  0x1d   : > { %v225_v14 = vcombine.low %v220_v5, %v224_v6  ;;  %v251_v15 = vcombine.low %v246_v10, %v250_v11 }
  0x1e   : > { %v276_v16 = vcombine.low %v271_v12, %v275_v13  ;;  %p482_p3 = por %p481_p2, %p480_p1 }
  0x1f   : > { %v227_v17 = vmul.f32 %v225_v14, %v212_v9  ;;  %v253_v18 = vmul.f32 %v251_v15, %v212_v9 }
  0x20   : > { %v278_v19 = vmul.f32 %v276_v16, %v212_v9  ;;  %p483_p5 = pnand %p482_p3, %p476_p0 }
  0x21   : > { %v229_v20 = vcombine.high %v227_v17, %v227_v17  ;;  %v232_v21 = vsel %vm231_vm0, %v227_v17, 0.0  ;;  %v255_v22 = vcombine.high %v253_v18, %v253_v18  ;;  %v257_v26 = vsel %vm231_vm0, %v253_v18, 0.0 }
  0x22   : > { %v280_v23 = vcombine.high %v278_v19, %v278_v19  ;;  %v282_v24 = vsel %vm231_vm0, %v278_v19, 0.0 }
  0x23   : > { %v233_v25 = vsel %vm231_vm0, %v229_v20, 0.0  ;;  %v258_v28 = vsel %vm231_vm0, %v255_v22, 0.0 }
  0x24   : > { %v234_v27 = vadd.f32 %v233_v25, %v232_v21  ;;  %v283_v29 = vsel %vm231_vm0, %v280_v23, 0.0  ;;  %v259_v31 = vadd.f32 %v258_v28, %v257_v26 }
  0x25   : > { %v284_v30 = vadd.f32 %v283_v29, %v282_v24 }
  0x26   : > { %235 = vadd.xlane.f32.xlu0 %v234_v27 }
  0x27   : > { %285 = vadd.xlane.f32.xlu1 %v284_v30 }
  0x2a   : > { %260 = vadd.xlane.f32.xlu0 %v259_v31 }
  0xb3   : > { %v236_v34 = vpop.xlane.xlu0 %235 }
  0xb4   : > { %v286_v35 = vpop.xlane.xlu1 %285  ;;  %v238_v37 = vsel %vm237_vm2, %v236_v34, 0.0 }
  0xb5   : > { %v288_v39 = vsel %vm287_vm4, %v286_v35, 0.0 }
  0xb7   : > { %v261_v36 = vpop.xlane.xlu0 %260 }
  0xb8   : > { %v263_v38 = vsel %vm262_vm3, %v261_v36, 0.0 }
  0xb9   : > { %v264_v40 = vadd.f32 %v263_v38, %v238_v37 }
  0xbb   : > { %v289_v42 = vadd.f32 %v288_v39, %v264_v40 }
  0xbd   : > { %v291_v43 = vadd.f32 %v290_v41, %v289_v42 }
  0xbf   : > { %293 = vst.msk [vmem:[%s185_s5] sm:$0xf] %vm210_vm1, %v291_v43 }
  0xc0   : > { %486 = shalt.err (!%p483_p5)
}
  0xc1   : > { %s487_s25 = scalar_lea.hbm %s639_s16, 64  ;;  %s491_s28 = scalar_lea.hbm %s689_s2, 128 }
  0xc2   : > { %p488_p6 = scmp.ne.s32.totalorder %s639_s16, %s487_s25  ;;  %p492_p10 = scmp.lt.u32.totalorder %s639_s16, %s689_s2 }
  0xc3   : > { %p493_p11 = scmp.lt.u32.totalorder %s491_s28, %s487_s25  ;;  %p495_p13 = scmp.lt.u32.totalorder %s487_s25, %s639_s16 }
  0xc4   : > { %p489_p7 = pnand %p488_p6, %p610_p4 }
  0xc5   : > { %p494_p12 = por %p493_p11, %p492_p10 }
  0xc6   : > { %p490_p9 = pneg %p489_p7 }
  0xc7   : > { %p496_p0 = por %p495_p13, %p494_p12 }
  0xc9   : > { %p497_p1 = pnand %p496_p0, %p490_p9 }
  0xcb   : > { %500 = shalt.err (!%p497_p1)
}
  0xcc   : > { %417 = dma.vmem_to_hbm [thread:$0]  (%p610_p4), %s641_s7, 64, %s639_s16, %s295_s18  }
  0xcd PF: > { %p423_p2 = scmp.ge.s32.totalorder %s551_s14, 2  ;;  %s320_s3 = sand.u32 1, %s531_s9  }
  0xce   : > { %s321_s4 = scalar_lea.sflag [#allocation3], %s320_s3 }
  0xcf   : > { %p420_p3 = pnand %p423_p2, %p617_p8 }
  0xd1   : > { %526 = dma.done.wait (!%p420_p3), %s321_s4, 64  }
  0xd2   : > { %528 = vsyncadd (!%p420_p3), %s321_s4, 4294967232  ;;  %s15_s14 = sadd.s32 1, %s551_s14   ;;  %s692_s9 = smov %s535_s10 }
  0xd3   : > { %p12_p5 = scmp.ge.s32.totalorder %s15_s14, 4   ;;  %s693_s10 = smov %s539_s11 }
  0xd4   : > { %s694_s11 = smov %s623_s22  ;;  %s695_s12 = smov %s547_s13 }
  0xd5   : > { %s696_s13 = smov %s698_s17  ;;  %14 = sbr.rel (!%p12_p5) target bundleno = 4 (0x4), region = 72 }
  0xdc   :  { %326 = vsyncpa [#allocation3], 1 }
  0xdd   :  { %328 = vsyncpa [#allocation3 + $0x1], 1 }

</bundles_post_ra>
